<compile_context>
chip_gen: v6e
topology: v6e:2x2x1
jax: 0.10.0
libtpu: 0.0.40
codegen_flags: <defaults>
</compile_context>

<pallas_src>
from functools import lru_cache, partial

import numpy as np
import jax
import jax.numpy as jnp
from jax import lax
from jax.experimental import pallas as pl
from jax.experimental.pallas import tpu as pltpu

BINS = (1, 2, 3, 6)
NB = len(BINS)
SIZES = [b * b for b in BINS]
OFFS = np.concatenate([[0], np.cumsum(SIZES)]).astype(int)   # [0, 1, 5, 14, 50]
PTOT = int(OFFS[-1])                                          # 50 pooled positions total


# ---------------------------------------------------------------- host-side operators
def _adaptive_pool_matrix(out_size, in_size):
    # matches nn.AdaptiveAvgPool2d window arithmetic
    m = np.zeros((out_size, in_size), np.float32)
    for i in range(out_size):
        s = (i * in_size) // out_size
        e = -(-((i + 1) * in_size) // out_size)  # ceil
        m[i, s:e] = 1.0 / (e - s)
    return m


def _bilinear_matrix(out_size, in_size):
    # matches F.interpolate(mode='bilinear', align_corners=False)
    m = np.zeros((out_size, in_size), np.float32)
    if in_size == 1:
        m[:, 0] = 1.0
        return m
    scale = in_size / out_size
    for i in range(out_size):
        src = max((i + 0.5) * scale - 0.5, 0.0)
        i0 = min(int(np.floor(src)), in_size - 1)
        i1 = min(i0 + 1, in_size - 1)
        f = src - i0
        m[i, i0] += 1.0 - f
        m[i, i1] += f
    return m


@lru_cache(maxsize=None)
def _operators(H, W):
    """PT (HW, PTOT): pool via x @ PT.  UT (PTOT, HW): upsample via y @ UT."""
    HW = H * W
    P = np.zeros((PTOT, HW), np.float32)
    UT = np.zeros((PTOT, HW), np.float32)
    for k, b in enumerate(BINS):
        o = OFFS[k]
        P[o:o + b * b, :] = np.kron(_adaptive_pool_matrix(b, H),
                                    _adaptive_pool_matrix(b, W))
        UT[o:o + b * b, :] = np.kron(_bilinear_matrix(H, b),
                                     _bilinear_matrix(W, b)).T
    return np.ascontiguousarray(P.T), UT


@lru_cache(maxsize=None)
def _mask(red):
    """(NB*red, PTOT) block mask: branch k's channels only see branch k's pooled cols."""
    m = np.zeros((NB * red, PTOT), np.float32)
    for k, b in enumerate(BINS):
        m[k * red:(k + 1) * red, OFFS[k]:OFFS[k] + b * b] = 1.0
    return m


def _tensorcores_per_device():
    """Best-effort: 2 TensorCores per device on megacore chips (v4/v5p/v7x), else 1."""
    try:
        kind = jax.devices()[0].device_kind.lower()
    except Exception:
        return 1
    return 2 if ("v4" in kind or "v5p" in kind or "7" in kind) else 1


# ---------------------------------------------------------------- Pallas kernel
def _ppm_kernel(x_ref, pt_ref, w1_ref, b1_ref, m_ref, ut_ref,
                wfx_ref, wfb_ref, b2_ref, o_ref):
    # x_ref:  (B, Cin, HW)         channel-major, HW on lanes (lane-dense)
    # pt_ref: (HW, PTOT)           pool operator (all bins stacked)
    # w1_ref: (NB*red, Cin)        branch 1x1 convs, BN scale folded in
    # b1_ref: (NB*red, 1)  f32     branch BN bias
    # m_ref:  (NB*red, PTOT) f32   branch/bin validity mask
    # ut_ref: (PTOT, HW)           bilinear upsample operator (all bins stacked)
    # wfx_ref:(Cout, Cin)          final 1x1 conv block acting on x (scale folded)
    # wfb_ref:(Cout, NB*red)       final 1x1 conv block acting on branches (scale folded)
    # b2_ref: (Cout, 1)    f32     final BN bias
    # o_ref:  (B, Cout, HW) f32
    cdt = w1_ref.dtype                      # MXU operand dtype (bf16 or f32)
    B, Cin, HW = x_ref.shape

    x_all = x_ref[...]                                                      # (B, Cin, HW)
    # Flattened pooling matmul: (B*Cin, HW) @ (HW, PTOT) — better MXU row fill.
    pooled_all = jnp.dot(x_all.reshape(B * Cin, HW), pt_ref[...],
                         preferred_element_type=jnp.float32)                # f32 accumulate
    pooled_all = pooled_all.astype(cdt)                                     # back to MXU dtype

    for b in range(B):                       # static unroll, B is 1 or N (tiny)
        xb = x_all[b]                                                       # (Cin, HW)
        pooled = pooled_all[b * Cin:(b + 1) * Cin]                          # (Cin, PTOT)
        y = jnp.dot(w1_ref[...], pooled, preferred_element_type=jnp.float32)  # (NBred, PTOT)
        y = jnp.maximum(y + b1_ref[...], 0.0) * m_ref[...]                  # BN bias + ReLU, kill cross-bin
        t = jnp.dot(wfb_ref[...], y.astype(cdt),
                    preferred_element_type=jnp.float32)                     # (Cout, PTOT)
        z = (jnp.dot(wfx_ref[...], xb, preferred_element_type=jnp.float32)  # x contribution
             + jnp.dot(t.astype(cdt), ut_ref[...],
                       preferred_element_type=jnp.float32))                 # upsampled branch contribution
        o_ref[b] = jnp.maximum(z + b2_ref[...], 0.0)                        # final BN bias + ReLU


# ---------------------------------------------------------------- wrapper
@partial(jax.jit, static_argnames=("eps", "mxu_dtype"))
def pyramid_pooling_module(x_nchw, params, eps=1e-5, mxu_dtype=jnp.bfloat16):
    N, Cin, H, W = x_nchw.shape
    HW = H * W
    red = params["w1"].shape[1]
    Cout = params["wf"].shape[0]
    NBred = NB * red

    PT_np, UT_np = _operators(H, W)          # cached numpy constants (trace time only)
    M_np = _mask(red)

    # fold BN (inference-mode) scales into the conv weights
    s1 = params["g1"] / jnp.sqrt(params["var1"] + eps)                # (NB, red)
    W1 = (params["w1"] * s1[:, :, None]).reshape(NBred, Cin)          # (NB*red, Cin)
    B1 = (params["beta1"] - params["mean1"] * s1).reshape(NBred, 1)
    s2 = params["g2"] / jnp.sqrt(params["var2"] + eps)                # (Cout,)
    WF = params["wf"] * s2[:, None]                                   # (Cout, Cin+NB*red)
    WFX, WFB = WF[:, :Cin], WF[:, Cin:]
    B2 = (params["beta2"] - params["mean2"] * s2).reshape(Cout, 1)

    x_flat = x_nchw.reshape(N, Cin, HW)                               # free reshape of NCHW

    # Batch layout: fold the whole batch into one grid step on single-TC chips
    # (v5e/v6e -> no per-step pipeline overhead); keep grid=(N,) "parallel" on
    # dual-TC chips (v7x) so batch elements shard across TensorCores.
    bb = 1 if (_tensorcores_per_device() > 1 and N > 1) else N
    num_blocks = N // bb

    # vmem limit computed from actual block sizes (double-buffer bound + margin)
    mdt = np.dtype(mxu_dtype)
    f32 = np.dtype(np.float32)
    block_bytes = sum(int(np.prod(s)) * d.itemsize for s, d in [
        ((bb, Cin, HW), mdt), ((HW, PTOT), mdt), ((NBred, Cin), mdt),
        ((NBred, 1), f32), ((NBred, PTOT), f32), ((PTOT, HW), mdt),
        ((Cout, Cin), mdt), ((Cout, NBred), mdt), ((Cout, 1), f32),
        ((bb, Cout, HW), f32)])
    vmem_limit = int(min(max(2 * block_bytes + (2 << 20), 4 << 20), 64 << 20))

    flops = 2 * N * (Cin * HW * PTOT          # pooling
                     + NBred * Cin * PTOT     # branch 1x1 convs
                     + Cout * NBred * PTOT    # final conv, branch block
                     + Cout * Cin * HW        # final conv, x block
                     + Cout * PTOT * HW)      # upsample of branch contribution
    bytes_accessed = (N * Cin * HW * mdt.itemsize + N * Cout * HW * 4
                      + 2 * HW * PTOT * mdt.itemsize
                      + (NBred * Cin + Cout * Cin + Cout * NBred) * mdt.itemsize
                      + (NBred * (PTOT + 1) + Cout) * 4)

    out = pl.pallas_call(
        _ppm_kernel,
        out_shape=jax.ShapeDtypeStruct((N, Cout, HW), jnp.float32),
        grid=(num_blocks,),
        in_specs=[
            pl.BlockSpec((bb, Cin, HW), lambda n: (n, 0, 0)),
            pl.BlockSpec((HW, PTOT), lambda n: (0, 0)),
            pl.BlockSpec((NBred, Cin), lambda n: (0, 0)),
            pl.BlockSpec((NBred, 1), lambda n: (0, 0)),
            pl.BlockSpec((NBred, PTOT), lambda n: (0, 0)),
            pl.BlockSpec((PTOT, HW), lambda n: (0, 0)),
            pl.BlockSpec((Cout, Cin), lambda n: (0, 0)),
            pl.BlockSpec((Cout, NBred), lambda n: (0, 0)),
            pl.BlockSpec((Cout, 1), lambda n: (0, 0)),
        ],
        out_specs=pl.BlockSpec((bb, Cout, HW), lambda n: (n, 0, 0)),
        compiler_params=pltpu.CompilerParams(
            dimension_semantics=("parallel",),
            vmem_limit_bytes=vmem_limit),
        cost_estimate=pl.CostEstimate(flops=flops, transcendentals=0,
                                      bytes_accessed=bytes_accessed),
    )(x_flat.astype(mxu_dtype),
      jnp.asarray(PT_np, mxu_dtype), W1.astype(mxu_dtype), B1,
      jnp.asarray(M_np), jnp.asarray(UT_np, mxu_dtype),
      WFX.astype(mxu_dtype), WFB.astype(mxu_dtype), B2)

    return out.reshape(N, Cout, H, W)                                 # free reshape back to NCHW


# ---------------------------------------------------------------- pure-JAX reference
def reference_forward(x_nchw, params, eps=1e-5):
    N, Cin, H, W = x_nchw.shape
    HW = H * W
    hp = lax.Precision.HIGHEST
    xf = x_nchw.reshape(N, Cin, HW)
    outs = [xf]
    for k, b in enumerate(BINS):
        Pk = jnp.asarray(np.kron(_adaptive_pool_matrix(b, H), _adaptive_pool_matrix(b, W)))
        Uk = jnp.asarray(np.kron(_bilinear_matrix(H, b), _bilinear_matrix(W, b)))
        pooled = jnp.einsum("ps,ncs->ncp", Pk, xf, precision=hp)               # (N, Cin, b*b)
        y = jnp.einsum("dc,ncp->ndp", params["w1"][k], pooled, precision=hp)   # (N, red, b*b)
        s = params["g1"][k] / jnp.sqrt(params["var1"][k] + eps)
        y = (y - params["mean1"][k][None, :, None]) * s[None, :, None] \
            + params["beta1"][k][None, :, None]
        y = jnp.maximum(y, 0.0)
        outs.append(jnp.einsum("sp,ndp->nds", Uk, y, precision=hp))            # (N, red, HW)
    cat = jnp.concatenate(outs, axis=1)                                        # (N, Cin+NB*red, HW)
    z = jnp.einsum("oc,ncs->nos", params["wf"], cat, precision=hp)
    s2 = params["g2"] / jnp.sqrt(params["var2"] + eps)
    z = (z - params["mean2"][None, :, None]) * s2[None, :, None] \
        + params["beta2"][None, :, None]
    z = jnp.maximum(z, 0.0)
    return z.reshape(N, -1, H, W)


# ---------------------------------------------------------------- main
if __name__ == "__main__":
    key = jax.random.PRNGKey(0)
    kx, kw1, kwf, kg1, kb1, kg2, kb2 = jax.random.split(key, 7)

    N, in_dim, H, W = 2, 16, 16, 16
    out_dim = 8
    red = in_dim // NB          # reduction_dim = in_dim // len(bins) = 4
    eps = 1e-5

    # branch 1x1 conv weights (per-branch, shape (red, Cin)) + BN params
    w1 = 0.2 * jax.random.normal(kw1, (NB, red, in_dim), jnp.float32)
    g1 = 1.0 + 0.1 * jax.random.normal(kg1, (NB, red), jnp.float32)
    beta1 = 0.1 * jax.random.normal(kb1, (NB, red), jnp.float32)
    mean1 = 0.05 * jnp.arange(red, dtype=jnp.float32)[None, :] * jnp.ones((NB, 1))
    var1 = 1.0 + 0.1 * jnp.arange(red, dtype=jnp.float32)[None, :] * jnp.ones((NB, 1))

    # final 1x1 conv weights on concat([x, branches]) + BN params
    wf = 0.2 * jax.random.normal(kwf, (out_dim, in_dim + NB * red), jnp.float32)
    g2 = 1.0 + 0.1 * jax.random.normal(kg2, (out_dim,), jnp.float32)
    beta2 = 0.1 * jax.random.normal(kb2, (out_dim,), jnp.float32)
    mean2 = 0.02 * jnp.arange(out_dim, dtype=jnp.float32)
    var2 = 1.0 + 0.05 * jnp.arange(out_dim, dtype=jnp.float32)

    params = dict(w1=w1, g1=g1, beta1=beta1, mean1=mean1, var1=var1,
                  wf=wf, g2=g2, beta2=beta2, mean2=mean2, var2=var2)

    x = jax.random.normal(kx, (N, in_dim, H, W), jnp.float32)  # NCHW, like PyTorch

    ref = jax.block_until_ready(reference_forward(x, params, eps=eps))

    # Production path: bf16 MXU operands, f32 accumulation (bf16-appropriate tolerance).
    out_bf16 = jax.block_until_ready(
        pyramid_pooling_module(x, params, eps=eps, mxu_dtype=jnp.bfloat16))
    assert out_bf16.shape == (N, out_dim, H, W), out_bf16.shape
    assert bool(jnp.all(jnp.isfinite(out_bf16)))
    assert bool(jnp.allclose(out_bf16, ref, rtol=5e-2, atol=5e-2)), \
        float(jnp.max(jnp.abs(out_bf16 - ref)))

    # Exact-semantics check: f32 MXU path against the reference at tight tolerance.
    out_f32 = jax.block_until_ready(
        pyramid_pooling_module(x, params, eps=eps, mxu_dtype=jnp.float32))
    assert out_f32.shape == (N, out_dim, H, W), out_f32.shape
    assert bool(jnp.all(jnp.isfinite(out_f32)))
    assert bool(jnp.allclose(out_f32, ref, rtol=2e-3, atol=2e-3)), \
        float(jnp.max(jnp.abs(out_f32 - ref)))

    print("KERNEL_OK")
</pallas_src>

<mosaic_0001>
module attributes {stable_mosaic.version = 11 : i64} {
  func.func @_ppm_kernel(%arg0: i32, %arg1: memref<2x16x256xbf16, #tpu.memory_space<vmem>>, %arg2: memref<256x50xbf16, #tpu.memory_space<vmem>>, %arg3: memref<16x16xbf16, #tpu.memory_space<vmem>>, %arg4: memref<16x1xf32, #tpu.memory_space<vmem>>, %arg5: memref<16x50xf32, #tpu.memory_space<vmem>>, %arg6: memref<50x256xbf16, #tpu.memory_space<vmem>>, %arg7: memref<8x16xbf16, #tpu.memory_space<vmem>>, %arg8: memref<8x16xbf16, #tpu.memory_space<vmem>>, %arg9: memref<8x1xf32, #tpu.memory_space<vmem>>, %arg10: memref<2x8x256xf32, #tpu.memory_space<vmem>>) attributes {dimension_semantics = [#tpu.dimension_semantics<parallel>], iteration_bounds = array<i64: 1>, scalar_prefetch = 0 : i64, scratch_operands = 0 : i64, tpu.core_type = #tpu.core_type<tc>, window_params = [{transform_indices = @transform_0, window_bounds = array<i64: 2, 16, 256>}, {pipeline_mode = #tpu.pipeline_mode<synchronous>, transform_indices = @transform_1, window_bounds = array<i64: 256, 50>}, {pipeline_mode = #tpu.pipeline_mode<synchronous>, transform_indices = @transform_2, window_bounds = array<i64: 16, 16>}, {pipeline_mode = #tpu.pipeline_mode<synchronous>, transform_indices = @transform_3, window_bounds = array<i64: 16, 1>}, {pipeline_mode = #tpu.pipeline_mode<synchronous>, transform_indices = @transform_4, window_bounds = array<i64: 16, 50>}, {pipeline_mode = #tpu.pipeline_mode<synchronous>, transform_indices = @transform_5, window_bounds = array<i64: 50, 256>}, {pipeline_mode = #tpu.pipeline_mode<synchronous>, transform_indices = @transform_6, window_bounds = array<i64: 8, 16>}, {pipeline_mode = #tpu.pipeline_mode<synchronous>, transform_indices = @transform_7, window_bounds = array<i64: 8, 16>}, {pipeline_mode = #tpu.pipeline_mode<synchronous>, transform_indices = @transform_8, window_bounds = array<i64: 8, 1>}, {transform_indices = @transform_9, window_bounds = array<i64: 2, 8, 256>}]} {
    %c0 = arith.constant 0 : index
    %c0_0 = arith.constant 0 : index
    %c0_1 = arith.constant 0 : index
    %0 = vector.load %arg1[%c0, %c0_0, %c0_1] : memref<2x16x256xbf16, #tpu.memory_space<vmem>>, vector<2x16x256xbf16>
    %1 = vector.shape_cast %0 : vector<2x16x256xbf16> to vector<32x256xbf16>
    %c0_2 = arith.constant 0 : index
    %c0_3 = arith.constant 0 : index
    %2 = vector.load %arg2[%c0_2, %c0_3] : memref<256x50xbf16, #tpu.memory_space<vmem>>, vector<256x50xbf16>
    %cst = arith.constant dense<0.000000e+00> : vector<32x50xf32>
    %3 = tpu.matmul %1, %2, %cst {dimension_numbers = #tpu.dot_dimension_numbers<[1], [0], [0], [1], [0, 0, 1, 1], [], []>} : vector<32x256xbf16>, vector<256x50xbf16>, vector<32x50xf32> -> vector<32x50xf32>
    %4 = arith.truncf %3 : vector<32x50xf32> to vector<32x50xbf16>
    %5 = vector.extract_strided_slice %0 {offsets = [0, 0, 0], sizes = [1, 16, 256], strides = [1, 1, 1]} : vector<2x16x256xbf16> to vector<1x16x256xbf16>
    %6 = vector.shape_cast %5 : vector<1x16x256xbf16> to vector<16x256xbf16>
    %7 = vector.extract_strided_slice %4 {offsets = [0, 0], sizes = [16, 50], strides = [1, 1]} : vector<32x50xbf16> to vector<16x50xbf16>
    %c0_4 = arith.constant 0 : index
    %c0_5 = arith.constant 0 : index
    %8 = vector.load %arg3[%c0_4, %c0_5] : memref<16x16xbf16, #tpu.memory_space<vmem>>, vector<16x16xbf16>
    %cst_6 = arith.constant dense<0.000000e+00> : vector<16x50xf32>
    %9 = tpu.matmul %8, %7, %cst_6 {dimension_numbers = #tpu.dot_dimension_numbers<[1], [0], [0], [1], [0, 0, 1, 1], [], []>} : vector<16x16xbf16>, vector<16x50xbf16>, vector<16x50xf32> -> vector<16x50xf32>
    %c0_7 = arith.constant 0 : index
    %c0_8 = arith.constant 0 : index
    %10 = vector.load %arg4[%c0_7, %c0_8] : memref<16x1xf32, #tpu.memory_space<vmem>>, vector<16x1xf32>
    %11 = vector.broadcast %10 : vector<16x1xf32> to vector<16x50xf32>
    %12 = arith.addf %9, %11 : vector<16x50xf32>
    %cst_9 = arith.constant 0.000000e+00 : f32
    %13 = vector.broadcast %cst_9 : f32 to vector<16x50xf32>
    %14 = arith.maximumf %12, %13 : vector<16x50xf32>
    %c0_10 = arith.constant 0 : index
    %c0_11 = arith.constant 0 : index
    %15 = vector.load %arg5[%c0_10, %c0_11] : memref<16x50xf32, #tpu.memory_space<vmem>>, vector<16x50xf32>
    %16 = arith.mulf %14, %15 : vector<16x50xf32>
    %c0_12 = arith.constant 0 : index
    %c0_13 = arith.constant 0 : index
    %17 = vector.load %arg8[%c0_12, %c0_13] : memref<8x16xbf16, #tpu.memory_space<vmem>>, vector<8x16xbf16>
    %18 = arith.truncf %16 : vector<16x50xf32> to vector<16x50xbf16>
    %cst_14 = arith.constant dense<0.000000e+00> : vector<8x50xf32>
    %19 = tpu.matmul %17, %18, %cst_14 {dimension_numbers = #tpu.dot_dimension_numbers<[1], [0], [0], [1], [0, 0, 1, 1], [], []>} : vector<8x16xbf16>, vector<16x50xbf16>, vector<8x50xf32> -> vector<8x50xf32>
    %c0_15 = arith.constant 0 : index
    %c0_16 = arith.constant 0 : index
    %20 = vector.load %arg7[%c0_15, %c0_16] : memref<8x16xbf16, #tpu.memory_space<vmem>>, vector<8x16xbf16>
    %cst_17 = arith.constant dense<0.000000e+00> : vector<8x256xf32>
    %21 = tpu.matmul %20, %6, %cst_17 {dimension_numbers = #tpu.dot_dimension_numbers<[1], [0], [0], [1], [0, 0, 1, 1], [], []>} : vector<8x16xbf16>, vector<16x256xbf16>, vector<8x256xf32> -> vector<8x256xf32>
    %22 = arith.truncf %19 : vector<8x50xf32> to vector<8x50xbf16>
    %c0_18 = arith.constant 0 : index
    %c0_19 = arith.constant 0 : index
    %23 = vector.load %arg6[%c0_18, %c0_19] : memref<50x256xbf16, #tpu.memory_space<vmem>>, vector<50x256xbf16>
    %cst_20 = arith.constant dense<0.000000e+00> : vector<8x256xf32>
    %24 = tpu.matmul %22, %23, %cst_20 {dimension_numbers = #tpu.dot_dimension_numbers<[1], [0], [0], [1], [0, 0, 1, 1], [], []>} : vector<8x50xbf16>, vector<50x256xbf16>, vector<8x256xf32> -> vector<8x256xf32>
    %25 = arith.addf %21, %24 : vector<8x256xf32>
    %c0_21 = arith.constant 0 : index
    %c0_22 = arith.constant 0 : index
    %26 = vector.load %arg9[%c0_21, %c0_22] : memref<8x1xf32, #tpu.memory_space<vmem>>, vector<8x1xf32>
    %27 = vector.broadcast %26 : vector<8x1xf32> to vector<8x256xf32>
    %28 = arith.addf %25, %27 : vector<8x256xf32>
    %cst_23 = arith.constant 0.000000e+00 : f32
    %29 = vector.broadcast %cst_23 : f32 to vector<8x256xf32>
    %30 = arith.maximumf %28, %29 : vector<8x256xf32>
    %c0_24 = arith.constant 0 : index
    %c0_25 = arith.constant 0 : index
    %c0_26 = arith.constant 0 : index
    %31 = vector.load %arg10[%c0_24, %c0_25, %c0_26] : memref<2x8x256xf32, #tpu.memory_space<vmem>>, vector<1x8x256xf32>
    %32 = vector.shape_cast %31 : vector<1x8x256xf32> to vector<8x256xf32>
    %33 = vector.shape_cast %30 : vector<8x256xf32> to vector<1x8x256xf32>
    tpu.vector_store %arg10[%c0_24, %c0_25, %c0_26], %33 {strides = array<i32>} : memref<2x8x256xf32, #tpu.memory_space<vmem>>, vector<1x8x256xf32>,
    %34 = vector.extract_strided_slice %0 {offsets = [1, 0, 0], sizes = [1, 16, 256], strides = [1, 1, 1]} : vector<2x16x256xbf16> to vector<1x16x256xbf16>
    %35 = vector.shape_cast %34 : vector<1x16x256xbf16> to vector<16x256xbf16>
    %36 = vector.extract_strided_slice %4 {offsets = [16, 0], sizes = [16, 50], strides = [1, 1]} : vector<32x50xbf16> to vector<16x50xbf16>
    %c0_27 = arith.constant 0 : index
    %c0_28 = arith.constant 0 : index
    %37 = vector.load %arg3[%c0_27, %c0_28] : memref<16x16xbf16, #tpu.memory_space<vmem>>, vector<16x16xbf16>
    %cst_29 = arith.constant dense<0.000000e+00> : vector<16x50xf32>
    %38 = tpu.matmul %37, %36, %cst_29 {dimension_numbers = #tpu.dot_dimension_numbers<[1], [0], [0], [1], [0, 0, 1, 1], [], []>} : vector<16x16xbf16>, vector<16x50xbf16>, vector<16x50xf32> -> vector<16x50xf32>
    %c0_30 = arith.constant 0 : index
    %c0_31 = arith.constant 0 : index
    %39 = vector.load %arg4[%c0_30, %c0_31] : memref<16x1xf32, #tpu.memory_space<vmem>>, vector<16x1xf32>
    %40 = vector.broadcast %39 : vector<16x1xf32> to vector<16x50xf32>
    %41 = arith.addf %38, %40 : vector<16x50xf32>
    %cst_32 = arith.constant 0.000000e+00 : f32
    %42 = vector.broadcast %cst_32 : f32 to vector<16x50xf32>
    %43 = arith.maximumf %41, %42 : vector<16x50xf32>
    %c0_33 = arith.constant 0 : index
    %c0_34 = arith.constant 0 : index
    %44 = vector.load %arg5[%c0_33, %c0_34] : memref<16x50xf32, #tpu.memory_space<vmem>>, vector<16x50xf32>
    %45 = arith.mulf %43, %44 : vector<16x50xf32>
    %c0_35 = arith.constant 0 : index
    %c0_36 = arith.constant 0 : index
    %46 = vector.load %arg8[%c0_35, %c0_36] : memref<8x16xbf16, #tpu.memory_space<vmem>>, vector<8x16xbf16>
    %47 = arith.truncf %45 : vector<16x50xf32> to vector<16x50xbf16>
    %cst_37 = arith.constant dense<0.000000e+00> : vector<8x50xf32>
    %48 = tpu.matmul %46, %47, %cst_37 {dimension_numbers = #tpu.dot_dimension_numbers<[1], [0], [0], [1], [0, 0, 1, 1], [], []>} : vector<8x16xbf16>, vector<16x50xbf16>, vector<8x50xf32> -> vector<8x50xf32>
    %c0_38 = arith.constant 0 : index
    %c0_39 = arith.constant 0 : index
    %49 = vector.load %arg7[%c0_38, %c0_39] : memref<8x16xbf16, #tpu.memory_space<vmem>>, vector<8x16xbf16>
    %cst_40 = arith.constant dense<0.000000e+00> : vector<8x256xf32>
    %50 = tpu.matmul %49, %35, %cst_40 {dimension_numbers = #tpu.dot_dimension_numbers<[1], [0], [0], [1], [0, 0, 1, 1], [], []>} : vector<8x16xbf16>, vector<16x256xbf16>, vector<8x256xf32> -> vector<8x256xf32>
    %51 = arith.truncf %48 : vector<8x50xf32> to vector<8x50xbf16>
    %c0_41 = arith.constant 0 : index
    %c0_42 = arith.constant 0 : index
    %52 = vector.load %arg6[%c0_41, %c0_42] : memref<50x256xbf16, #tpu.memory_space<vmem>>, vector<50x256xbf16>
    %cst_43 = arith.constant dense<0.000000e+00> : vector<8x256xf32>
    %53 = tpu.matmul %51, %52, %cst_43 {dimension_numbers = #tpu.dot_dimension_numbers<[1], [0], [0], [1], [0, 0, 1, 1], [], []>} : vector<8x50xbf16>, vector<50x256xbf16>, vector<8x256xf32> -> vector<8x256xf32>
    %54 = arith.addf %50, %53 : vector<8x256xf32>
    %c0_44 = arith.constant 0 : index
    %c0_45 = arith.constant 0 : index
    %55 = vector.load %arg9[%c0_44, %c0_45] : memref<8x1xf32, #tpu.memory_space<vmem>>, vector<8x1xf32>
    %56 = vector.broadcast %55 : vector<8x1xf32> to vector<8x256xf32>
    %57 = arith.addf %54, %56 : vector<8x256xf32>
    %cst_46 = arith.constant 0.000000e+00 : f32
    %58 = vector.broadcast %cst_46 : f32 to vector<8x256xf32>
    %59 = arith.maximumf %57, %58 : vector<8x256xf32>
    %c1 = arith.constant 1 : index
    %c0_47 = arith.constant 0 : index
    %c0_48 = arith.constant 0 : index
    %60 = vector.load %arg10[%c1, %c0_47, %c0_48] : memref<2x8x256xf32, #tpu.memory_space<vmem>>, vector<1x8x256xf32>
    %61 = vector.shape_cast %60 : vector<1x8x256xf32> to vector<8x256xf32>
    %62 = vector.shape_cast %59 : vector<8x256xf32> to vector<1x8x256xf32>
    tpu.vector_store %arg10[%c1, %c0_47, %c0_48], %62 {strides = array<i32>} : memref<2x8x256xf32, #tpu.memory_space<vmem>>, vector<1x8x256xf32>,
    return
  }
  func.func @transform_0(%arg0: i32) -> (i32, i32, i32) {
    %c0_i32 = arith.constant 0 : i32
    %c0_i32_0 = arith.constant 0 : i32
    %c0_i32_1 = arith.constant 0 : i32
    return %arg0, %c0_i32, %c0_i32_0 : i32, i32, i32
  }
  func.func @transform_1(%arg0: i32) -> (i32, i32) {
    %c0_i32 = arith.constant 0 : i32
    %c0_i32_0 = arith.constant 0 : i32
    %c0_i32_1 = arith.constant 0 : i32
    return %c0_i32, %c0_i32_0 : i32, i32
  }
  func.func @transform_2(%arg0: i32) -> (i32, i32) {
    %c0_i32 = arith.constant 0 : i32
    %c0_i32_0 = arith.constant 0 : i32
    %c0_i32_1 = arith.constant 0 : i32
    return %c0_i32, %c0_i32_0 : i32, i32
  }
  func.func @transform_3(%arg0: i32) -> (i32, i32) {
    %c0_i32 = arith.constant 0 : i32
    %c0_i32_0 = arith.constant 0 : i32
    %c0_i32_1 = arith.constant 0 : i32
    return %c0_i32, %c0_i32_0 : i32, i32
  }
  func.func @transform_4(%arg0: i32) -> (i32, i32) {
    %c0_i32 = arith.constant 0 : i32
    %c0_i32_0 = arith.constant 0 : i32
    %c0_i32_1 = arith.constant 0 : i32
    return %c0_i32, %c0_i32_0 : i32, i32
  }
  func.func @transform_5(%arg0: i32) -> (i32, i32) {
    %c0_i32 = arith.constant 0 : i32
    %c0_i32_0 = arith.constant 0 : i32
    %c0_i32_1 = arith.constant 0 : i32
    return %c0_i32, %c0_i32_0 : i32, i32
  }
  func.func @transform_6(%arg0: i32) -> (i32, i32) {
    %c0_i32 = arith.constant 0 : i32
    %c0_i32_0 = arith.constant 0 : i32
    %c0_i32_1 = arith.constant 0 : i32
    return %c0_i32, %c0_i32_0 : i32, i32
  }
  func.func @transform_7(%arg0: i32) -> (i32, i32) {
    %c0_i32 = arith.constant 0 : i32
    %c0_i32_0 = arith.constant 0 : i32
    %c0_i32_1 = arith.constant 0 : i32
    return %c0_i32, %c0_i32_0 : i32, i32
  }
  func.func @transform_8(%arg0: i32) -> (i32, i32) {
    %c0_i32 = arith.constant 0 : i32
    %c0_i32_0 = arith.constant 0 : i32
    %c0_i32_1 = arith.constant 0 : i32
    return %c0_i32, %c0_i32_0 : i32, i32
  }
  func.func @transform_9(%arg0: i32) -> (i32, i32, i32) {
    %c0_i32 = arith.constant 0 : i32
    %c0_i32_0 = arith.constant 0 : i32
    %c0_i32_1 = arith.constant 0 : i32
    return %arg0, %c0_i32, %c0_i32_0 : i32, i32, i32
  }
}

</mosaic_0001>

<bundles_post_ra>
// kernel: pyramid_pooling_module.1
= control target key start
LH: loop header
LB: loop body
LE: loop exit
PB: predicated region body
PF: predicated region fallthrough
CT: control target
= control target key end

     0   :  { %v924_v18 = vmov 0.0   ;;  %vm925_vm0 = vmmov 0   ;;  %v926_v19 = vmov 0   ;;  %vm255_vm1 = vcmask 130048   ;;  %s1160_s1 = inlined_call_operand.vmem [shape: bf16[256,50], index: 1, kind: input, shape index: {}]   ;;  %s1161_s0 = inlined_call_operand.vmem [shape: bf16[2,16,256], index: 0, kind: input, shape index: {}]   ;;  %s1162_s2 = inlined_call_operand.vmem [shape: bf16[16,16], index: 2, kind: input, shape index: {}]   ;;  %s1163_s3 = inlined_call_operand.vmem [shape: f32[16,1], index: 3, kind: input, shape index: {}]   ;;  %s1164_s8 = inlined_call_operand.vmem [shape: f32[8,1], index: 8, kind: input, shape index: {}]   ;;  %s1165_s5 = inlined_call_operand.vmem [shape: bf16[50,256], index: 5, kind: input, shape index: {}]   ;;  %s1166_s4 = inlined_call_operand.vmem [shape: f32[16,50], index: 4, kind: input, shape index: {}]   ;;  %s1167_s7 = inlined_call_operand.vmem [shape: bf16[8,16], index: 7, kind: input, shape index: {}]   ;;  %s1168_s6 = inlined_call_operand.vmem [shape: bf16[8,16], index: 6, kind: input, shape index: {}]   ;;  %s1169_s9 = inlined_call_operand.vmem [shape: f32[2,8,256], index: 9, kind: output, shape index: {}]  }
   0x1   :  { %v887_v0 = vld [vmem:[%s1160_s1 + $0x78] sm:$0xff]   ;;  %v889_v2 = vld [vmem:[%s1160_s1 + $0x70] sm:$0xff]   ;;  %v891_v4 = vld [vmem:[%s1160_s1 + $0x68] sm:$0xff]   ;;  %858 = vmatprep.subr.bf16.mxu1 %v924_v18  ;;  %860 = vmatprep.mubr.msk.bf16.mxu1 %vm925_vm0, %v924_v18  ;;  %vm399_vm2 = vcmask 1040384   ;;  %vm395_vm3 = vcmask 408576  }
   0x2   :  { %v888_v1 = vld [vmem:[%s1160_s1 + $0x38] sm:$0xff]   ;;  %822 = vmatprep.subr.bf16.mxu0 %v887_v0  ;;  %v890_v3 = vld [vmem:[%s1160_s1 + $0x30] sm:$0xff]   ;;  %v892_v5 = vld [vmem:[%s1160_s1 + $0x28] sm:$0xff]   ;;  %885 = vset.pattern.permute.xlu0 %v926_v19 }
   0x3   :  { %823 = vmatpush3.bf16.msra.mxu0 %v888_v1  ;;  %v893_v6 = vld [vmem:[%s1160_s1 + $0x60] sm:$0xff]   ;;  %v895_v8 = vld [vmem:[%s1160_s1 + $0x58] sm:$0xff]   ;;  %v897_v10 = vld [vmem:[%s1160_s1 + $0x50] sm:$0xff]   ;;  %886 = vset.pattern.permute.xlu1 %v926_v19 }
   0x4   :  { %824 = vmatprep.subr.bf16.mxu0 %v889_v2  ;;  %v894_v7 = vld [vmem:[%s1160_s1 + $0x20] sm:$0xff]   ;;  %v896_v9 = vld [vmem:[%s1160_s1 + $0x18] sm:$0xff]   ;;  %v898_v12 = vld [vmem:[%s1160_s1 + $0x10] sm:$0xff]  }
   0x5   :  { %v1013_v11 = vld [vmem:[%s1161_s0 + $0x4] ss:$8 sps:$4 sm:$0xff]   ;;  %v1034_v17 = vld [vmem:[%s1161_s0] ss:$8 sps:$4 sm:$0xff]   ;;  %v1062_v31 = vld [vmem:[%s1161_s0 + $0x14] ss:$8 sps:$4 sm:$0xff]  }
   0x6   :  { %217 = vmatprep.mubr.bf16.mxu0 %v1013_v11  ;;  %v899_v13 = vld [vmem:[%s1160_s1 + $0x48] sm:$0xff]   ;;  %v901_v15 = vld [vmem:[%s1160_s1 + $0x40] sm:$0xff]   ;;  %v1067_v32 = vld [vmem:[%s1161_s0 + $0x10] ss:$8 sps:$4 sm:$0xff]  }
   0x7   :  { %825 = vmatpush3.bf16.msra.mxu0 %v890_v3  ;;  %v900_v14 = vld [vmem:[%s1160_s1 + $0x8] sm:$0xff]   ;;  %v902_v16 = vld [vmem:[%s1160_s1] sm:$0xff]   ;;  %v359_v45 = vld [vmem:[%s1165_s5 + $0x30] sm:$0x11] }
   0x8   :  { %826 = vmatprep.subr.bf16.mxu0 %v891_v4  ;;  %v238_v20 = vld [vmem:[%s1163_s3] sm:$0xff]  ;;  %v239_v21 = vld [vmem:[%s1163_s3 + $0x8] sm:$0xff]  ;;  %v802_v48 = vcombine.high %v359_v45, %v359_v45  ;;  %v801_v49 = vcombine.low %v359_v45, %v359_v45  ;;  %v917_v55 = vld [vmem:[%s1165_s5 + $0x14] ss:$8 sps:$4 sm:$0xff]  }
   0x9   :  { %242 = vperm.xlu0 %885, %v238_v20   ;;  %509 = vperm.xlu1 %886, %v238_v20   ;;  %v491_v22 = vld [vmem:[%s1164_s8] sm:$0xff]  ;;  %v1081_v42 = vld [vmem:[%s1166_s4 + $0x8] sm:$0xff]  ;;  %v915_v56 = vld [vmem:[%s1165_s5 + $0x10] ss:$8 sps:$4 sm:$0xff]  }
   0xa   :  { %v906_v30 = vld [vmem:[%s1162_s2] sm:$0xff]   ;;  %v401_v52 = vsel %vm399_vm2, %v801_v49, 0 }
   0xb   :  { %827 = vmatpush3.bf16.msra.mxu0 %v892_v5  ;;  %v1076_v41 = vld [vmem:[%s1166_s4] sm:$0xff] }
   0xc   :  { %828 = vmatprep.subr.bf16.mxu0 %v893_v6  ;;  %v306_v51 = vld [vmem:[%s1167_s7] sm:$0xf]  ;;  %v914_v53 = vld [vmem:[%s1165_s5 + $0x24] ss:$8 sps:$4 sm:$0xff]  }
   0xd   :  { %247 = vperm.xlu0 %885, %v239_v21   ;;  %514 = vperm.xlu1 %886, %v239_v21   ;;  %v912_v54 = vld [vmem:[%s1165_s5 + $0x20] ss:$8 sps:$4 sm:$0xff]   ;;  %v920_v57 = vld [vmem:[%s1165_s5 + $0x4] ss:$8 sps:$4 sm:$0xff]  }
   0xe   :  { %v918_v58 = vld [vmem:[%s1165_s5] ss:$8 sps:$4 sm:$0xff]  }
   0xf   :  { %829 = vmatpush3.bf16.msra.mxu0 %v894_v7  ;;  %v351_v7 = vld [vmem:[%s1168_s6] sm:$0xf] }
  0x10   :  { %830 = vmatprep.subr.bf16.mxu0 %v895_v8  ;;  %v921_v8 = vld [vmem:[%s1162_s2] sm:$0xff]  }
  0x11   :  { %494 = vperm.xlu0 %885, %v491_v22   ;;  %758 = vperm.xlu1 %886, %v491_v22  }
  0x13   :  { %831 = vmatpush3.bf16.msra.mxu0 %v896_v9  ;;  %v625_v9 = vld [vmem:[%s1165_s5 + $0x30] sm:$0x11] }
  0x14   :  { %832 = vmatprep.subr.bf16.mxu0 %v897_v10  ;;  %v816_v10 = vcombine.high %v625_v9, %v625_v9 }
  0x17   :  { %833 = vmatpush3.bf16.msra.mxu0 %v898_v12 }
  0x18   :  { %834 = vmatprep.subr.bf16.mxu0 %v899_v13 }
  0x1b   :  { %835 = vmatpush3.bf16.msra.mxu0 %v900_v14 }
  0x1c   :  { %836 = vmatprep.subr.bf16.mxu0 %v901_v15 }
  0x1f   :  { %837 = vmatpush3.bf16.msra.mxu0 %v902_v16 }
  0x20   :  { %876 = vmatprep.subr.bf16.mxu0 %v924_v18 }
  0x22   :  { %218 = vmatmul.mubr.bf16.vlgmr.msra.gmra.mxu0 %v1034_v17 }
  0x23   :  { %225 = vmatprep.mubr.bf16.mxu0 %v1062_v31 }
  0x2a   :  { %226 = vmatmul.mubr.bf16.gmra.mxu0 %v1067_v32 }
  0x2b   :  { %878 = vmatprep.mubr.msk.bf16.mxu0 %vm925_vm0, %v924_v18 }
  0x84   :  { %v243_v33 = vpop.permute.xlu0 %242 }
  0x88   :  { %v248_v37 = vpop.permute.xlu0 %247 }
  0x8c   :  { %v495_v20 = vpop.permute.xlu0 %494 }
  0xe2   :  { %v838_v23 = vpop.f32.mrf.mxu0 }
  0xe4   :  { %v839_v24 = vpop.f32.mrf.mxu0 }
  0xe5   :  { %v840_v27 = vadd.f32 %v839_v24, %v838_v23 }
  0xe6   :  { %v841_v25 = vpop.f32.mrf.mxu0 }
  0xe8   :  { %v842_v26 = vpop.f32.mrf.mxu0 }
  0xe9   :  { %v843_v28 = vadd.f32 %v842_v26, %v841_v25 }
  0xea   :  { %v844_v59 = vpop.f32.mrf.mxu0 }
  0xeb   :  { %v234_v29 = vpack.c.bf16 %v843_v28, %v840_v27  ;;  %v510_v27 = vpop.permute.xlu1 %509 }
  0xec   :  { %v845_v60 = vpop.f32.mrf.mxu0 }
  0xed   :  { %859 = vmatpush3.bf16.msra.mxu1 %v234_v29  ;;  %v846_v2 = vadd.f32 %v845_v60, %v844_v59 }
  0xee   :  { %864 = vmatprep.subr.bf16.mxu1 %v924_v18  ;;  %v847_v61 = vpop.f32.mrf.mxu0 }
  0xf0   :  { %861 = vmatmul.mubr.msk.bf16.vlgmr.msra.gmra.mxu1 %vm255_vm1, %v906_v30  ;;  %v848_v0 = vpop.f32.mrf.mxu0 }
  0xf1   :  { %866 = vmatprep.mubr.msk.bf16.mxu1 %vm925_vm0, %v924_v18  ;;  %v849_v4 = vadd.f32 %v848_v0, %v847_v61 }
  0xf3   :  { %v235_v6 = vpack.c.bf16 %v849_v4, %v846_v2 }
 0x1b0   :  { %v293_v34 = vpop.f32.mrf.mxu1 }
 0x1b1   :  { %v294_v35 = vadd.f32 %v293_v34, %v243_v33 }
 0x1b2   :  { %v862_v36 = vpop.f32.mrf.mxu1 }
 0x1b3   :  { %v300_v39 = vmax.f32 %v294_v35, 0.0  ;;  %v515_v35 = vpop.permute.xlu1 %514 }
 0x1b4   :  { %v296_v38 = vpop.f32.mrf.mxu1 }
 0x1b5   :  { %v297_v40 = vadd.f32 %v296_v38, %v248_v37  ;;  %v304_v46 = vmul.f32 %v1076_v41, %v300_v39 }
 0x1b6   :  { %v863_v43 = vpop.f32.mrf.mxu1 }
 0x1b7   :  { %v301_v44 = vmax.f32 %v297_v40, 0.0 }
 0x1b9   :  { %v305_v47 = vmul.f32 %v1081_v42, %v301_v44 }
 0x1bb   :  { %v307_v50 = vpack.c.bf16 %v305_v47, %v304_v46  ;;  %v572_v46 = vld [vmem:[%s1167_s7] sm:$0xf] }
 0x1bd   :  { %865 = vmatpush3.bf16.msra.mxu1 %v307_v50 }
 0x1be   :  { %803 = vmatprep.subr.msk.bf16.mxu1 %vm399_vm2, %v802_v48 }
 0x1c0   :  { %867 = vmatmul.mubr.msk.bf16.vlgmr.msra.gmra.mxu1 %vm255_vm1, %v306_v51 }
 0x1c1   :  { %415 = vmatpush1.bf16.msra.mxu1 %v401_v52  ;;  %438 = vmatprep.mubr.bf16.mxu1 %v926_v19 }
 0x1c2   :  { %416 = vmatprep.subr.bf16.mxu1 %v914_v53 }
 0x1c5   :  { %417 = vmatpush1.bf16.msra.mxu1 %v912_v54 }
 0x1c6   :  { %418 = vmatprep.subr.bf16.mxu1 %v917_v55 }
 0x1c9   :  { %419 = vmatpush1.bf16.msra.mxu1 %v915_v56 }
 0x1ca   :  { %420 = vmatprep.subr.bf16.mxu1 %v920_v57 }
 0x1cd   :  { %421 = vmatpush1.bf16.msra.mxu1 %v918_v58 }
 0x1ce   :  { %464 = vmatprep.subr.bf16.mxu1 %v1013_v11  ;;  %v815_v11 = vcombine.low %v625_v9, %v625_v9 }
 0x1d0   :  { %v665_v12 = vsel %vm399_vm2, %v815_v11, 0 }
 0x280   :  { %v345_v62 = vpop.f32.mrf.mxu1 }
 0x281   :  { %v352_v63 = vpack.c.bf16 %v345_v62, %v345_v62 }
 0x282   :  { %v868_v1 = vpop.f32.mrf.mxu1 }
 0x283   :  { %804 = vmatmul.mubr.msk.bf16.vlgmr.msra.gmra.mxu1 %vm395_vm3, %v352_v63 }
 0x284   :  { %v348_v3 = vpop.f32.mrf.mxu1  ;;  %465 = vmatpush1.bf16.msra.mxu1 %v1034_v17  ;;  %482 = vmatprep.mubr.bf16.mxu1 %v926_v19 }
 0x285   :  { %870 = vmatprep.subr.bf16.mxu1 %v924_v18 }
 0x286   :  { %v869_v5 = vpop.f32.mrf.mxu1 }
 0x28b   :  { %805 = vmatmul.mubr.msk.bf16.vlgmr.msra.gmra.mxu1 %vm255_vm1, %v351_v7 }
 0x28c   :  { %871 = vmatpush3.bf16.msra.mxu1 %v235_v6  ;;  %872 = vmatprep.mubr.msk.bf16.mxu1 %vm925_vm0, %v924_v18 }
 0x28d   :  { %817 = vmatprep.subr.msk.bf16.mxu1 %vm399_vm2, %v816_v10 }
 0x293   :  { %873 = vmatmul.mubr.msk.bf16.vlgmr.msra.gmra.mxu1 %vm255_vm1, %v921_v8 }
 0x294   :  { %702 = vmatprep.mubr.bf16.mxu1 %v926_v19  ;;  %679 = vmatpush1.bf16.msra.mxu1 %v665_v12 }
 0x295   :  { %680 = vmatprep.subr.bf16.mxu1 %v914_v53 }
 0x298   :  { %681 = vmatpush1.bf16.msra.mxu1 %v912_v54 }
 0x299   :  { %682 = vmatprep.subr.bf16.mxu1 %v917_v55 }
 0x29c   :  { %683 = vmatpush1.bf16.msra.mxu1 %v915_v56 }
 0x29d   :  { %684 = vmatprep.subr.bf16.mxu1 %v920_v57 }
 0x2a0   :  { %685 = vmatpush1.bf16.msra.mxu1 %v918_v58 }
 0x343   :  { %v440_v13 = vpop.f32.mrf.mxu1 }
 0x345   :  { %v442_v14 = vpop.f32.mrf.mxu1 }
 0x347   :  { %v444_v15 = vpop.f32.mrf.mxu1 }
 0x349   :  { %v445_v16 = vpop.f32.mrf.mxu1 }
 0x34b   :  { %v484_v17 = vpop.f32.mrf.mxu1 }
 0x34c   :  { %v485_v18 = vadd.f32 %v484_v17, %v440_v13 }
 0x34d   :  { %v486_v21 = vpop.f32.mrf.mxu1 }
 0x34e   :  { %v497_v22 = vadd.f32 %v495_v20, %v485_v18  ;;  %v487_v23 = vadd.f32 %v486_v21, %v442_v14 }
 0x34f   :  { %v488_v24 = vpop.f32.mrf.mxu1 }
 0x350   :  { %v499_v25 = vmax.f32 %v497_v22, 0.0  ;;  %v498_v26 = vadd.f32 %v495_v20, %v487_v23 }
 0x351   :  { %v489_v28 = vpop.f32.mrf.mxu1 }
 0x352   :  { %501 = vst [vmem:[%s1169_s9] sm:$0xff] %v499_v25  ;;  %v500_v29 = vmax.f32 %v498_v26, 0.0 }
 0x353   :  { %v559_v30 = vpop.f32.mrf.mxu1 }
 0x354   :  { %502 = vst [vmem:[%s1169_s9 + $0x8] sm:$0xff] %v500_v29  ;;  %v560_v33 = vadd.f32 %v559_v30, %v510_v27 }
 0x355   :  { %v874_v34 = vpop.f32.mrf.mxu1 }
 0x356   :  { %v566_v37 = vmax.f32 %v560_v33, 0.0 }
 0x357   :  { %v562_v36 = vpop.f32.mrf.mxu1 }
 0x358   :  { %v563_v38 = vadd.f32 %v562_v36, %v515_v35  ;;  %v570_v43 = vmul.f32 %v566_v37, %v1076_v41  ;;  %v617_v41 = vld [vmem:[%s1168_s6] sm:$0xf] }
 0x359   :  { %v875_v39 = vpop.f32.mrf.mxu1 }
 0x35a   :  { %v567_v40 = vmax.f32 %v563_v38, 0.0 }
 0x35c   :  { %v571_v44 = vmul.f32 %v567_v40, %v1081_v42 }
 0x35e   :  { %v573_v45 = vpack.c.bf16 %v571_v44, %v570_v43 }
 0x360   :  { %877 = vmatpush3.bf16.msra.mxu0 %v573_v45 }
 0x361   :  { %728 = vmatprep.subr.bf16.mxu0 %v1062_v31 }
 0x363   :  { %879 = vmatmul.mubr.msk.bf16.vlgmr.msra.gmra.mxu0 %vm255_vm1, %v572_v46 }
 0x364   :  { %729 = vmatpush1.bf16.msra.mxu0 %v1067_v32  ;;  %746 = vmatprep.mubr.bf16.mxu0 %v926_v19  ;;  %v759_v19 = vpop.permute.xlu1 %758 }
 0x36b   :  { %819 = vmatmul.mubr.msk.bf16.vlgmr.msra.gmra.mxu0 %vm255_vm1, %v617_v41 }
 0x423   :  { %v611_v42 = vpop.f32.mrf.mxu0 }
 0x424   :  { %v618_v47 = vpack.c.bf16 %v611_v42, %v611_v42 }
 0x425   :  { %v880_v48 = vpop.f32.mrf.mxu0 }
 0x426   :  { %818 = vmatmul.mubr.msk.bf16.vlgmr.msra.gmra.mxu1 %vm395_vm3, %v618_v47 }
 0x427   :  { %v614_v49 = vpop.f32.mrf.mxu0 }
 0x429   :  { %v881_v50 = vpop.f32.mrf.mxu0 }
 0x42b   :  { %v748_v31 = vpop.f32.mrf.mxu0 }
 0x42d   :  { %v750_v51 = vpop.f32.mrf.mxu0 }
 0x42f   :  { %v752_v52 = vpop.f32.mrf.mxu0 }
 0x431   :  { %v753_v53 = vpop.f32.mrf.mxu0 }
 0x4e6   :  { %v704_v32 = vpop.f32.mrf.mxu1 }
 0x4e7   :  { %v749_v54 = vadd.f32 %v748_v31, %v704_v32 }
 0x4e8   :  { %v706_v55 = vpop.f32.mrf.mxu1 }
 0x4e9   :  { %v761_v56 = vadd.f32 %v759_v19, %v749_v54  ;;  %v751_v57 = vadd.f32 %v750_v51, %v706_v55 }
 0x4ea   :  { %v708_v58 = vpop.f32.mrf.mxu1 }
 0x4eb   :  { %v763_v59 = vmax.f32 %v761_v56, 0.0  ;;  %v762_v60 = vadd.f32 %v759_v19, %v751_v57 }
 0x4ec   :  { %v709_v61 = vpop.f32.mrf.mxu1 }
 0x4ed   :  { %820 = vst [vmem:[%s1169_s9 + $0x10] sm:$0xff] %v763_v59  ;;  %v764_v62 = vmax.f32 %v762_v60, 0.0 }
 0x4ef   :  { %821 = vst [vmem:[%s1169_s9 + $0x18] sm:$0xff] %v764_v62 }

</bundles_post_ra>
